<compile_context>
chip_gen: v6e
topology: v6e:2x2x1
jax: 0.10.0
libtpu: 0.0.40
codegen_flags: <defaults>
</compile_context>

<pallas_src>
import functools

import jax
import jax.numpy as jnp
from jax import lax
from jax.experimental import pallas as pl
from jax.experimental.pallas import tpu as pltpu


MXU_DTYPE = jnp.float32   # switch to jnp.bfloat16 on v6e/v7x for speed (numerics change)


# ----------------------------------------------------------------------------
# Plain-JAX glue: depthwise convs, layernorm-over-channels, GELU, ref points,
# and the bilinear tap (index + weight) builder.
# TODO(synk): depthwise 3x3 convs / layernorm / gelu stay in plain JAX (XLA conv
# is already efficient and they are not the hot path at these sizes).
# ----------------------------------------------------------------------------

def depthwise_conv3x3(x, w, b, stride):
    """x: (B,C,H,W), w: (C,1,3,3), b: (C,) or None. groups=C, pad=1."""
    C = x.shape[1]
    y = lax.conv_general_dilated(
        x, w, window_strides=(stride, stride), padding=((1, 1), (1, 1)),
        dimension_numbers=('NCHW', 'OIHW', 'NCHW'), feature_group_count=C)
    if b is not None:
        y = y + b[None, :, None, None]
    return y


def layer_norm_channels(x, gamma, beta, eps=1e-5):
    """LayerNormProxy: LayerNorm over the channel dim of an NCHW tensor."""
    mu = jnp.mean(x, axis=1, keepdims=True)
    var = jnp.mean((x - mu) ** 2, axis=1, keepdims=True)
    xn = (x - mu) / jnp.sqrt(var + eps)
    return xn * gamma[None, :, None, None] + beta[None, :, None, None]


def get_ref_points(Hk, Wk, B, dtype):
    ref_y = jnp.linspace(0.5, Hk - 0.5, Hk, dtype=dtype)
    ref_x = jnp.linspace(0.5, Wk - 0.5, Wk, dtype=dtype)
    ry, rx = jnp.meshgrid(ref_y, ref_x, indexing='ij')
    ref = jnp.stack([ry / Hk * 2.0 - 1.0, rx / Wk * 2.0 - 1.0], axis=-1)  # (Hk,Wk,2)=(y,x)
    return jnp.broadcast_to(ref[None], (B, Hk, Wk, 2))


def bilinear_taps(grid_xy, H, W):
    """F.grid_sample(mode='bilinear', align_corners=True) as 4 tap indices + weights.

    grid_xy: (B,Hk,Wk,2) with (x,y) in (-1,1) (values come from tanh -> always in
    bounds, so zero-padding never triggers).  Returns:
      idx: (B, 4, N) int32 flat pixel positions (y*W + x) of the 4 bilinear taps
      wts: (B, 4, N) f32   bilinear weights
    so that v_sampled[b,c,n] = sum_t wts[b,t,n] * value[b,c,idx[b,t,n]].
    The dense (N, H*W) one-hot weight matrix is built *inside* the Pallas kernel,
    so it never touches HBM.
    """
    B, Hk, Wk, _ = grid_xy.shape
    N = Hk * Wk
    gx = grid_xy[..., 0].reshape(B, N)
    gy = grid_xy[..., 1].reshape(B, N)
    ix = (gx + 1.0) * 0.5 * (W - 1)          # align_corners=True mapping
    iy = (gy + 1.0) * 0.5 * (H - 1)
    x0f = jnp.floor(ix)
    y0f = jnp.floor(iy)
    wx1 = ix - x0f
    wy1 = iy - y0f
    wx0 = 1.0 - wx1
    wy0 = 1.0 - wy1
    x0 = jnp.clip(x0f.astype(jnp.int32), 0, W - 1)
    x1 = jnp.clip(x0f.astype(jnp.int32) + 1, 0, W - 1)
    y0 = jnp.clip(y0f.astype(jnp.int32), 0, H - 1)
    y1 = jnp.clip(y0f.astype(jnp.int32) + 1, 0, H - 1)
    idx = jnp.stack([y0 * W + x0, y0 * W + x1, y1 * W + x0, y1 * W + x1], axis=1)
    wts = jnp.stack([wy0 * wx0, wy0 * wx1, wy1 * wx0, wy1 * wx1], axis=1)
    return idx.astype(jnp.int32), wts.astype(jnp.float32)


# ----------------------------------------------------------------------------
# Fused Pallas kernel (per batch-block):
#   wbil[m, n] = sum_t wts[t, n] * (m == idx[t, n])        built in-VMEM (VPU)
#   v_samp     = value @ wbil                               (C, N)   MXU
#   S          = v_samp @ k^T                               (C, C)   MXU (all heads at once)
#   S_bd       = S * blockdiag_head_mask                    (C, C)   VPU
#   y          = ((scale*W_out) @ S_bd) @ q                 (C, M)   MXU
# Equivalent to: attn = scale*q^T k per head (no softmax); out = v_samp @ attn^T;
# y = W_out @ out  -- i.e. the full grid_sample + attention + proj_out chain.
# ----------------------------------------------------------------------------

def _fused_sample_attn_proj_kernel(q_ref, k_ref, v_ref, idx_ref, wts_ref,
                                   mask_ref, wout_ref, o_ref, *, block_b):
    f32 = jnp.float32
    C = q_ref.shape[1]
    M = q_ref.shape[2]
    N = k_ref.shape[2]

    head_mask = mask_ref[...]                  # (C, C) block-diagonal head mask
    wout = wout_ref[...]                       # (C, C) proj_out weight, scale pre-folded

    # Row index m for every (m, n) entry; used to expand the 4 taps into the
    # bilinear one-hot sampling matrix without any HBM-resident weight slab.
    iota_m = lax.broadcasted_iota(jnp.int32, (M, N), 0)

    for b in range(block_b):                   # small static unroll over the batch block
        idx_b = idx_ref[b]                     # (4, N) int32 flat tap positions
        wts_b = wts_ref[b]                     # (4, N) f32   tap weights

        wbil = jnp.zeros((M, N), f32)          # wbil[m, n] = weight of pixel m for sample n
        for tap in range(4):
            sel = iota_m == idx_b[tap:tap + 1, :]
            wbil = wbil + jnp.where(sel, wts_b[tap:tap + 1, :], 0.0)

        q_b = q_ref[b]                         # (C, M)
        k_b = k_ref[b]                         # (C, N)
        v_b = v_ref[b]                         # (C, M)

        # grid_sample as a single MXU contraction: (C, M) @ (M, N) -> (C, N)
        v_samp = jnp.dot(v_b, wbil.astype(v_b.dtype),
                         preferred_element_type=f32)

        # All-head Gram matrix in one matmul, then mask to block-diagonal.
        s = lax.dot_general(v_samp.astype(k_b.dtype), k_b,
                            (((1,), (1,)), ((), ())),
                            preferred_element_type=f32)            # (C, C)
        s_bd = s * head_mask                                       # per-head blocks only

        t_mat = jnp.dot(wout, s_bd, preferred_element_type=f32)    # (C, C)
        y = jnp.dot(t_mat.astype(q_b.dtype), q_b,
                    preferred_element_type=f32)                    # (C, M), lane-dense

        o_ref[b] = y.astype(o_ref.dtype)


def _choose_block_b(B, per_batch_bytes, target_bytes=1 << 20):
    """Per-step DMA slab ~target_bytes, but keep >=2 steps per TensorCore when possible."""
    bblk = max(1, min(B, target_bytes // max(per_batch_bytes, 1)))
    while bblk > 1 and -(-B // bblk) < min(B, 4):   # keep at least 4 grid steps (2 per v7x TC)
        bblk -= 1
    while bblk > 1 and B % bblk != 0:               # avoid a ragged last block
        bblk -= 1
    return bblk


def fused_sample_attention_proj(q, k, vflat, tap_idx, tap_wts, wout_scaled,
                                n_heads, head_ch, *, block_b=None,
                                mxu_dtype=MXU_DTYPE):
    """q/vflat: (B,C,M); k: (B,C,N); tap_idx/tap_wts: (B,4,N); wout_scaled: (C,C) -> (B,C,M)."""
    B, C, M = q.shape
    N = k.shape[2]
    out_dtype = q.dtype
    mxu_size = jnp.dtype(mxu_dtype).itemsize

    # Optional bf16 cast of MXU operands (elementwise tap weights stay f32 -> v5e-safe).
    q = q.astype(mxu_dtype)
    k = k.astype(mxu_dtype)
    vflat = vflat.astype(mxu_dtype)

    # Block-diagonal head mask, precomputed once (avoids in-kernel integer division).
    head_idx = jnp.arange(C, dtype=jnp.int32) // head_ch
    head_mask = (head_idx[:, None] == head_idx[None, :]).astype(jnp.float32)

    per_batch_bytes = mxu_size * (2 * C * M + C * N) + 4 * (8 * N) + 4 * C * M
    if block_b is None:
        block_b = _choose_block_b(B, per_batch_bytes)
    grid = (B // block_b,)

    # Advisory cost + explicit VMEM budget (headroom over double-buffered blocks).
    flops = B * (2 * C * M * N + 2 * C * C * N + 2 * C * C * C + 2 * C * C * M + 8 * N * M)
    bytes_accessed = B * per_batch_bytes + 2 * C * C * 4
    per_step_bytes = block_b * per_batch_bytes + 2 * C * C * 4
    vmem_limit = int(min(max(4 * per_step_bytes + block_b * 4 * M * N, 32 << 20), 64 << 20))

    kernel = functools.partial(_fused_sample_attn_proj_kernel, block_b=block_b)

    return pl.pallas_call(
        kernel,
        out_shape=jax.ShapeDtypeStruct((B, C, M), out_dtype),
        grid_spec=pltpu.PrefetchScalarGridSpec(
            num_scalar_prefetch=0,
            grid=grid,
            in_specs=[
                pl.BlockSpec((block_b, C, M), lambda i: (i, 0, 0)),   # q
                pl.BlockSpec((block_b, C, N), lambda i: (i, 0, 0)),   # k
                pl.BlockSpec((block_b, C, M), lambda i: (i, 0, 0)),   # value
                pl.BlockSpec((block_b, 4, N), lambda i: (i, 0, 0)),   # bilinear tap indices
                pl.BlockSpec((block_b, 4, N), lambda i: (i, 0, 0)),   # bilinear tap weights
                pl.BlockSpec((C, C), lambda i: (0, 0)),               # head mask
                pl.BlockSpec((C, C), lambda i: (0, 0)),               # scale * W_out
            ],
            out_specs=pl.BlockSpec((block_b, C, M), lambda i: (i, 0, 0)),
        ),
        compiler_params=pltpu.CompilerParams(
            dimension_semantics=("parallel",),        # batch axis shards across v7x TCs
            vmem_limit_bytes=vmem_limit),
        cost_estimate=pl.CostEstimate(flops=int(flops), transcendentals=0,
                                      bytes_accessed=int(bytes_accessed)),
    )(q, k, vflat, tap_idx, tap_wts, head_mask, wout_scaled)


# ----------------------------------------------------------------------------
# Full forward (matches DeformableAttention.forward; drop paths are identity).
# ----------------------------------------------------------------------------

def deformable_attention_forward(params, x, n_heads, n_head_channels, stride):
    B, C, H, W = x.shape
    assert C == n_heads * n_head_channels
    scale = n_head_channels ** (-0.5)

    value = depthwise_conv3x3(x, params['v_w'], params['v_b'], 1)          # (B,C,H,W)
    query = depthwise_conv3x3(x, params['q_w'], params['q_b'], 1)          # (B,C,H,W)
    key_ = depthwise_conv3x3(x, params['k_w'], params['k_b'], stride)      # (B,C,Hk,Wk)

    off = depthwise_conv3x3(x, params['off_w'], params['off_b'], stride)   # (B,C,Hk,Wk)
    off = layer_norm_channels(off, params['ln_g'], params['ln_b'])
    off = jax.nn.gelu(off, approximate=False)
    offset = jnp.einsum('oc,bchw->bohw', params['off2_w'], off)            # (B,2,Hk,Wk)

    Hk, Wk = offset.shape[2], offset.shape[3]
    offset = jnp.transpose(offset, (0, 2, 3, 1))                           # (B,Hk,Wk,2)=(y,x)
    reference = get_ref_points(Hk, Wk, B, x.dtype)
    pos = jnp.tanh(offset + reference)                                     # (y,x)
    sgrid = pos[..., ::-1]                                                 # (x,y) for grid_sample

    tap_idx, tap_wts = bilinear_taps(sgrid, H, W)                          # (B,4,N)

    M, N = H * W, Hk * Wk
    q = query.reshape(B, C, M)      # channel dim is head-major, same as torch reshape
    k = key_.reshape(B, C, N)
    vflat = value.reshape(B, C, M)

    wout_scaled = params['out_w'] * scale   # fold attention scale into proj_out weight

    y = fused_sample_attention_proj(q, k, vflat, tap_idx, tap_wts, wout_scaled,
                                    n_heads, n_head_channels)              # (B,C,M)
    return y.reshape(B, C, H, W)


def init_params(key, embed_dim):
    ks = jax.random.split(key, 10)
    s = 0.1
    f32 = jnp.float32
    return {
        'v_w': jax.random.normal(ks[0], (embed_dim, 1, 3, 3), f32) * s,
        'v_b': jax.random.normal(ks[1], (embed_dim,), f32) * s,
        'q_w': jax.random.normal(ks[2], (embed_dim, 1, 3, 3), f32) * s,
        'q_b': jax.random.normal(ks[3], (embed_dim,), f32) * s,
        'k_w': jax.random.normal(ks[4], (embed_dim, 1, 3, 3), f32) * s,
        'k_b': jax.random.normal(ks[5], (embed_dim,), f32) * s,
        'off_w': jax.random.normal(ks[6], (embed_dim, 1, 3, 3), f32) * s,
        'off_b': jax.random.normal(ks[7], (embed_dim,), f32) * s,
        'ln_g': jnp.ones((embed_dim,), f32),
        'ln_b': jnp.zeros((embed_dim,), f32),
        'off2_w': jax.random.normal(ks[8], (2, embed_dim), f32) * s,         # 1x1 conv C->2, no bias
        'out_w': jax.random.normal(ks[9], (embed_dim, embed_dim), f32) * s,  # proj_out 1x1, no bias
    }


if __name__ == "__main__":
    embed_dim, n_heads, n_head_channels = 8, 2, 4
    stride = 2
    B, H, W = 2, 16, 16

    root = jax.random.PRNGKey(0)
    kx, kp = jax.random.split(root)
    x = jax.random.normal(kx, (B, embed_dim, H, W), jnp.float32)
    params = init_params(kp, embed_dim)

    fwd = jax.jit(functools.partial(deformable_attention_forward,
                                    n_heads=n_heads,
                                    n_head_channels=n_head_channels,
                                    stride=stride))
    y = fwd(params, x)
    jax.block_until_ready(y)
    assert y.shape == (B, embed_dim, H, W)
    assert y.dtype == jnp.float32
    print("KERNEL_OK")
</pallas_src>

<mosaic_0001>
module attributes {stable_mosaic.version = 11 : i64} {
  func.func @_fused_sample_attn_proj_kernel(%arg0: i32, %arg1: memref<1x8x256xf32, #tpu.memory_space<vmem>>, %arg2: memref<1x8x64xf32, #tpu.memory_space<vmem>>, %arg3: memref<1x8x256xf32, #tpu.memory_space<vmem>>, %arg4: memref<1x4x64xi32, #tpu.memory_space<vmem>>, %arg5: memref<1x4x64xf32, #tpu.memory_space<vmem>>, %arg6: memref<8x8xf32, #tpu.memory_space<vmem>>, %arg7: memref<8x8xf32, #tpu.memory_space<vmem>>, %arg8: memref<1x8x256xf32, #tpu.memory_space<vmem>>) attributes {dimension_semantics = [#tpu.dimension_semantics<parallel>], iteration_bounds = array<i64: 2>, scalar_prefetch = 0 : i64, scratch_operands = 0 : i64, tpu.core_type = #tpu.core_type<tc>, window_params = [{transform_indices = @transform_0, window_bounds = array<i64: 1, 8, 256>}, {transform_indices = @transform_1, window_bounds = array<i64: 1, 8, 64>}, {transform_indices = @transform_2, window_bounds = array<i64: 1, 8, 256>}, {transform_indices = @transform_3, window_bounds = array<i64: 1, 4, 64>}, {transform_indices = @transform_4, window_bounds = array<i64: 1, 4, 64>}, {pipeline_mode = #tpu.pipeline_mode<synchronous>, transform_indices = @transform_5, window_bounds = array<i64: 8, 8>}, {pipeline_mode = #tpu.pipeline_mode<synchronous>, transform_indices = @transform_6, window_bounds = array<i64: 8, 8>}, {transform_indices = @transform_7, window_bounds = array<i64: 1, 8, 256>}]} {
    %c0 = arith.constant 0 : index
    %c0_0 = arith.constant 0 : index
    %0 = vector.load %arg6[%c0, %c0_0] : memref<8x8xf32, #tpu.memory_space<vmem>>, vector<8x8xf32>
    %c0_1 = arith.constant 0 : index
    %c0_2 = arith.constant 0 : index
    %1 = vector.load %arg7[%c0_1, %c0_2] : memref<8x8xf32, #tpu.memory_space<vmem>>, vector<8x8xf32>
    %2 = tpu.iota {dimensions = array<i32: 0>} : vector<256x64xi32>
    %c0_3 = arith.constant 0 : index
    %c0_4 = arith.constant 0 : index
    %c0_5 = arith.constant 0 : index
    %3 = vector.load %arg4[%c0_3, %c0_4, %c0_5] : memref<1x4x64xi32, #tpu.memory_space<vmem>>, vector<1x4x64xi32>
    %4 = vector.shape_cast %3 : vector<1x4x64xi32> to vector<4x64xi32>
    %c0_6 = arith.constant 0 : index
    %c0_7 = arith.constant 0 : index
    %c0_8 = arith.constant 0 : index
    %5 = vector.load %arg5[%c0_6, %c0_7, %c0_8] : memref<1x4x64xf32, #tpu.memory_space<vmem>>, vector<1x4x64xf32>
    %6 = vector.shape_cast %5 : vector<1x4x64xf32> to vector<4x64xf32>
    %cst = arith.constant 0.000000e+00 : f32
    %7 = vector.broadcast %cst : f32 to vector<256x64xf32>
    %8 = vector.extract_strided_slice %4 {offsets = [0, 0], sizes = [1, 64], strides = [1, 1]} : vector<4x64xi32> to vector<1x64xi32>
    %9 = vector.broadcast %8 : vector<1x64xi32> to vector<256x64xi32>
    %10 = arith.cmpi eq, %2, %9 : vector<256x64xi32>
    %11 = vector.extract_strided_slice %6 {offsets = [0, 0], sizes = [1, 64], strides = [1, 1]} : vector<4x64xf32> to vector<1x64xf32>
    %cst_9 = arith.constant 0.000000e+00 : f32
    %12 = vector.shape_cast %11 : vector<1x64xf32> to vector<1x64xf32>
    %13 = vector.broadcast %12 : vector<1x64xf32> to vector<256x64xf32>
    %14 = vector.broadcast %cst_9 : f32 to vector<256x64xf32>
    %15 = arith.select %10, %13, %14 : vector<256x64xi1>, vector<256x64xf32>
    %16 = arith.addf %7, %15 : vector<256x64xf32>
    %17 = vector.extract_strided_slice %4 {offsets = [1, 0], sizes = [1, 64], strides = [1, 1]} : vector<4x64xi32> to vector<1x64xi32>
    %18 = vector.broadcast %17 : vector<1x64xi32> to vector<256x64xi32>
    %19 = arith.cmpi eq, %2, %18 : vector<256x64xi32>
    %20 = vector.extract_strided_slice %6 {offsets = [1, 0], sizes = [1, 64], strides = [1, 1]} : vector<4x64xf32> to vector<1x64xf32>
    %cst_10 = arith.constant 0.000000e+00 : f32
    %21 = vector.shape_cast %20 : vector<1x64xf32> to vector<1x64xf32>
    %22 = vector.broadcast %21 : vector<1x64xf32> to vector<256x64xf32>
    %23 = vector.broadcast %cst_10 : f32 to vector<256x64xf32>
    %24 = arith.select %19, %22, %23 : vector<256x64xi1>, vector<256x64xf32>
    %25 = arith.addf %16, %24 : vector<256x64xf32>
    %26 = vector.extract_strided_slice %4 {offsets = [2, 0], sizes = [1, 64], strides = [1, 1]} : vector<4x64xi32> to vector<1x64xi32>
    %27 = vector.broadcast %26 : vector<1x64xi32> to vector<256x64xi32>
    %28 = arith.cmpi eq, %2, %27 : vector<256x64xi32>
    %29 = vector.extract_strided_slice %6 {offsets = [2, 0], sizes = [1, 64], strides = [1, 1]} : vector<4x64xf32> to vector<1x64xf32>
    %cst_11 = arith.constant 0.000000e+00 : f32
    %30 = vector.shape_cast %29 : vector<1x64xf32> to vector<1x64xf32>
    %31 = vector.broadcast %30 : vector<1x64xf32> to vector<256x64xf32>
    %32 = vector.broadcast %cst_11 : f32 to vector<256x64xf32>
    %33 = arith.select %28, %31, %32 : vector<256x64xi1>, vector<256x64xf32>
    %34 = arith.addf %25, %33 : vector<256x64xf32>
    %35 = vector.extract_strided_slice %4 {offsets = [3, 0], sizes = [1, 64], strides = [1, 1]} : vector<4x64xi32> to vector<1x64xi32>
    %36 = vector.broadcast %35 : vector<1x64xi32> to vector<256x64xi32>
    %37 = arith.cmpi eq, %2, %36 : vector<256x64xi32>
    %38 = vector.extract_strided_slice %6 {offsets = [3, 0], sizes = [1, 64], strides = [1, 1]} : vector<4x64xf32> to vector<1x64xf32>
    %cst_12 = arith.constant 0.000000e+00 : f32
    %39 = vector.shape_cast %38 : vector<1x64xf32> to vector<1x64xf32>
    %40 = vector.broadcast %39 : vector<1x64xf32> to vector<256x64xf32>
    %41 = vector.broadcast %cst_12 : f32 to vector<256x64xf32>
    %42 = arith.select %37, %40, %41 : vector<256x64xi1>, vector<256x64xf32>
    %43 = arith.addf %34, %42 : vector<256x64xf32>
    %c0_13 = arith.constant 0 : index
    %c0_14 = arith.constant 0 : index
    %c0_15 = arith.constant 0 : index
    %44 = vector.load %arg1[%c0_13, %c0_14, %c0_15] : memref<1x8x256xf32, #tpu.memory_space<vmem>>, vector<1x8x256xf32>
    %45 = vector.shape_cast %44 : vector<1x8x256xf32> to vector<8x256xf32>
    %c0_16 = arith.constant 0 : index
    %c0_17 = arith.constant 0 : index
    %c0_18 = arith.constant 0 : index
    %46 = vector.load %arg2[%c0_16, %c0_17, %c0_18] : memref<1x8x64xf32, #tpu.memory_space<vmem>>, vector<1x8x64xf32>
    %47 = vector.shape_cast %46 : vector<1x8x64xf32> to vector<8x64xf32>
    %c0_19 = arith.constant 0 : index
    %c0_20 = arith.constant 0 : index
    %c0_21 = arith.constant 0 : index
    %48 = vector.load %arg3[%c0_19, %c0_20, %c0_21] : memref<1x8x256xf32, #tpu.memory_space<vmem>>, vector<1x8x256xf32>
    %49 = vector.shape_cast %48 : vector<1x8x256xf32> to vector<8x256xf32>
    %cst_22 = arith.constant dense<0.000000e+00> : vector<8x64xf32>
    %50 = tpu.matmul %49, %43, %cst_22 {dimension_numbers = #tpu.dot_dimension_numbers<[1], [0], [0], [1], [0, 0, 1, 1], [], []>} : vector<8x256xf32>, vector<256x64xf32>, vector<8x64xf32> -> vector<8x64xf32>
    %cst_23 = arith.constant dense<0.000000e+00> : vector<8x8xf32>
    %51 = tpu.matmul %50, %47, %cst_23 {dimension_numbers = #tpu.dot_dimension_numbers<[1], [1], [0], [0], [0, 0, 1, 0], [], []>} : vector<8x64xf32>, vector<8x64xf32>, vector<8x8xf32> -> vector<8x8xf32>
    %52 = arith.mulf %51, %0 : vector<8x8xf32>
    %cst_24 = arith.constant dense<0.000000e+00> : vector<8x8xf32>
    %53 = tpu.matmul %1, %52, %cst_24 {dimension_numbers = #tpu.dot_dimension_numbers<[1], [0], [0], [1], [0, 0, 1, 1], [], []>} : vector<8x8xf32>, vector<8x8xf32>, vector<8x8xf32> -> vector<8x8xf32>
    %cst_25 = arith.constant dense<0.000000e+00> : vector<8x256xf32>
    %54 = tpu.matmul %53, %45, %cst_25 {dimension_numbers = #tpu.dot_dimension_numbers<[1], [0], [0], [1], [0, 0, 1, 1], [], []>} : vector<8x8xf32>, vector<8x256xf32>, vector<8x256xf32> -> vector<8x256xf32>
    %c0_26 = arith.constant 0 : index
    %c0_27 = arith.constant 0 : index
    %c0_28 = arith.constant 0 : index
    %55 = vector.load %arg8[%c0_26, %c0_27, %c0_28] : memref<1x8x256xf32, #tpu.memory_space<vmem>>, vector<1x8x256xf32>
    %56 = vector.shape_cast %55 : vector<1x8x256xf32> to vector<8x256xf32>
    %57 = vector.shape_cast %54 : vector<8x256xf32> to vector<1x8x256xf32>
    tpu.vector_store %arg8[%c0_26, %c0_27, %c0_28], %57 {strides = array<i32>} : memref<1x8x256xf32, #tpu.memory_space<vmem>>, vector<1x8x256xf32>,
    return
  }
  func.func @transform_0(%arg0: i32) -> (i32, i32, i32) {
    %c0_i32 = arith.constant 0 : i32
    %c0_i32_0 = arith.constant 0 : i32
    %c0_i32_1 = arith.constant 0 : i32
    return %arg0, %c0_i32, %c0_i32_0 : i32, i32, i32
  }
  func.func @transform_1(%arg0: i32) -> (i32, i32, i32) {
    %c0_i32 = arith.constant 0 : i32
    %c0_i32_0 = arith.constant 0 : i32
    %c0_i32_1 = arith.constant 0 : i32
    return %arg0, %c0_i32, %c0_i32_0 : i32, i32, i32
  }
  func.func @transform_2(%arg0: i32) -> (i32, i32, i32) {
    %c0_i32 = arith.constant 0 : i32
    %c0_i32_0 = arith.constant 0 : i32
    %c0_i32_1 = arith.constant 0 : i32
    return %arg0, %c0_i32, %c0_i32_0 : i32, i32, i32
  }
  func.func @transform_3(%arg0: i32) -> (i32, i32, i32) {
    %c0_i32 = arith.constant 0 : i32
    %c0_i32_0 = arith.constant 0 : i32
    %c0_i32_1 = arith.constant 0 : i32
    return %arg0, %c0_i32, %c0_i32_0 : i32, i32, i32
  }
  func.func @transform_4(%arg0: i32) -> (i32, i32, i32) {
    %c0_i32 = arith.constant 0 : i32
    %c0_i32_0 = arith.constant 0 : i32
    %c0_i32_1 = arith.constant 0 : i32
    return %arg0, %c0_i32, %c0_i32_0 : i32, i32, i32
  }
  func.func @transform_5(%arg0: i32) -> (i32, i32) {
    %c0_i32 = arith.constant 0 : i32
    %c0_i32_0 = arith.constant 0 : i32
    %c0_i32_1 = arith.constant 0 : i32
    return %c0_i32, %c0_i32_0 : i32, i32
  }
  func.func @transform_6(%arg0: i32) -> (i32, i32) {
    %c0_i32 = arith.constant 0 : i32
    %c0_i32_0 = arith.constant 0 : i32
    %c0_i32_1 = arith.constant 0 : i32
    return %c0_i32, %c0_i32_0 : i32, i32
  }
  func.func @transform_7(%arg0: i32) -> (i32, i32, i32) {
    %c0_i32 = arith.constant 0 : i32
    %c0_i32_0 = arith.constant 0 : i32
    %c0_i32_1 = arith.constant 0 : i32
    return %arg0, %c0_i32, %c0_i32_0 : i32, i32, i32
  }
}

</mosaic_0001>

<bundles_post_ra>
// kernel: deformable_attention_forward.1
= control target key start
LH: loop header
LB: loop body
LE: loop exit
PB: predicated region body
PF: predicated region fallthrough
CT: control target
= control target key end

     0   :  { %s1341_s24 = smov 0   ;;  %s1715_s0 = inlined_call_operand.vmem [shape: f32[2,8,256], index: 0, kind: input, shape index: {}]   ;;  %s1716_s1 = inlined_call_operand.vmem [shape: f32[2,8,64], index: 1, kind: input, shape index: {}]   ;;  %s1717_s2 = inlined_call_operand.vmem [shape: f32[2,8,256], index: 2, kind: input, shape index: {}]   ;;  %s1718_s3 = inlined_call_operand.vmem [shape: s32[2,4,64], index: 3, kind: input, shape index: {}]   ;;  %s1719_s4 = inlined_call_operand.vmem [shape: f32[2,4,64], index: 4, kind: input, shape index: {}]   ;;  %s1720_s5 = inlined_call_operand.vmem [shape: f32[8,8], index: 5, kind: input, shape index: {}]   ;;  %s1721_s6 = inlined_call_operand.vmem [shape: f32[8,8], index: 6, kind: input, shape index: {}]   ;;  %s1722_s7 = inlined_call_operand.vmem [shape: f32[2,8,256], index: 7, kind: output, shape index: {}]  }
   0x1 LB: > { %s1209_s25 = sadd.s32 4294967295, %s1297_s24   ;;  %p1213_p0 = scmp.ge.s32.totalorder %s1297_s24, 1  ;;  %s1297_s24 = sphi %s1341_s24, %s17_s24  }
   0x2   : > { %p274_p1 = scmp.lt.s32.totalorder %s1297_s24, 3 }
   0x4   : > { %p275_p2 = pnand %p1213_p0, %p274_p1 }
   0x5   : > { %p323_p3 = scmp.lt.s32.totalorder (!%p275_p2), %s1209_s25, 1 }
   0x6   : > { %278 = sbr.rel (%p275_p2) target bundleno = 901 (0x385), region = 48 }
   0xb   : > { %v352_v0 = vlaneseq  ;;  %s1724_s25 = smov (!%p323_p3, %s1209_s25), 1 }
   0xc   : > { %s1219_s26 = sshll.u32 %s1724_s25, 2  ;;  %s1359_s27 = sshll.u32 %s1724_s25, 4 }
   0xd   : > { %v1351_v1 = vshrl.u32 %v352_v0, 7  ;;  %s340_s30 = scalar_lea.vmem %s1718_s3, %s1219_s26  ;;  %s344_s10 = scalar_lea.vmem %s1719_s4, %s1219_s26 }
   0xe   : > { %v385_v10 = vld [vmem:[%s340_s30] sm:$0xf]  ;;  %s1381_s13 = scalar_lea.vmem %s1717_s2, %s1359_s27  ;;  %s1216_s14 = sshll.u32 %s1724_s25, 3 }
   0xf   : > { %v384_v2 = vadd.s32 248, %v1351_v1  ;;  %v389_v3 = vsub.s32 0, %v1351_v1  ;;  %v493_v4 = vsub.s32 1, %v1351_v1  ;;  %v597_v5 = vsub.s32 2, %v1351_v1  ;;  %v386_v11 = vld [vmem:[%s344_s10] sm:$0xf]  ;;  %s331_s17 = scalar_lea.vmem %s1716_s1, %s1216_s14  ;;  %s327_s22 = scalar_lea.vmem %s1715_s0, %s1359_s27 }
  0x10   : > { %v701_v6 = vsub.s32 3, %v1351_v1  ;;  %v368_v7 = vadd.s32 120, %v1351_v1  ;;  %v383_v8 = vadd.s32 240, %v1351_v1  ;;  %v367_v9 = vadd.s32 112, %v1351_v1  ;;  %v807_v18 = vld [vmem:[%s1381_s13 + $0x8] sm:$0xff]  ;;  %s349_s29 = scalar_lea.vmem %s1722_s7, %s1359_s27 }
  0x11   : > { %v1372_v12 = vadd.s32 232, %v1351_v1  ;;  %v1375_v13 = vadd.s32 104, %v1351_v1  ;;  %v1383_v14 = vrot.slane %v385_v10, %v389_v3  ;;  %v1385_v15 = vrot.slane %v386_v11, %v389_v3  ;;  %872 = vmatprep.mubr.f32.mxu0 %v807_v18 }
  0x12   : > { %v1387_v16 = vrot.slane %v385_v10, %v493_v4  ;;  %v1389_v17 = vrot.slane %v386_v11, %v493_v4  ;;  %v1392_v19 = vrot.slane %v385_v10, %v597_v5  ;;  %v1394_v20 = vrot.slane %v386_v11, %v597_v5 }
  0x13   : > { %v1396_v21 = vrot.slane %v385_v10, %v701_v6  ;;  %v1398_v22 = vrot.slane %v386_v11, %v701_v6  ;;  %vm422_vm0 = vcmp.eq.s32.totalorder %v384_v2, %v1383_v14  ;;  %vm406_vm2 = vcmp.eq.s32.totalorder %v368_v7, %v1383_v14 }
  0x14   : > { %vm526_vm1 = vcmp.eq.s32.totalorder %v384_v2, %v1387_v16  ;;  %vm510_vm3 = vcmp.eq.s32.totalorder %v368_v7, %v1387_v16  ;;  %v458_v23 = vsel %vm422_vm0, %v1385_v15, 0.0  ;;  %vm630_vm4 = vcmp.eq.s32.totalorder %v384_v2, %v1392_v19 }
  0x15   : > { %v562_v24 = vsel %vm526_vm1, %v1389_v17, 0.0  ;;  %vm734_vm5 = vcmp.eq.s32.totalorder %v384_v2, %v1396_v21  ;;  %v666_v26 = vsel %vm630_vm4, %v1394_v20, 0.0  ;;  %v442_v28 = vsel %vm406_vm2, %v1385_v15, 0.0 }
  0x16   : > { %v594_v25 = vadd.f32 %v562_v24, %v458_v23  ;;  %v770_v27 = vsel %vm734_vm5, %v1398_v22, 0.0  ;;  %v546_v29 = vsel %vm510_vm3, %v1389_v17, 0.0  ;;  %vm614_vm6 = vcmp.eq.s32.totalorder %v368_v7, %v1392_v19 }
  0x17   : > { %vm718_vm7 = vcmp.eq.s32.totalorder %v368_v7, %v1396_v21  ;;  %vm421_vm8 = vcmp.eq.s32.totalorder %v383_v8, %v1383_v14  ;;  %v578_v31 = vadd.f32 %v546_v29, %v442_v28  ;;  %v650_v32 = vsel %vm614_vm6, %v1394_v20, 0.0 }
  0x18   : > { %v698_v30 = vadd.f32 %v666_v26, %v594_v25  ;;  %v754_v33 = vsel %vm718_vm7, %v1398_v22, 0.0  ;;  %v457_v34 = vsel %vm421_vm8, %v1385_v15, 0.0  ;;  %vm525_vm9 = vcmp.eq.s32.totalorder %v383_v8, %v1387_v16 }
  0x19   : > { %vm629_vm10 = vcmp.eq.s32.totalorder %v383_v8, %v1392_v19  ;;  %vm733_vm11 = vcmp.eq.s32.totalorder %v383_v8, %v1396_v21  ;;  %v682_v36 = vadd.f32 %v650_v32, %v578_v31  ;;  %v561_v37 = vsel %vm525_vm9, %v1389_v17, 0.0 }
  0x1a   : > { %v802_v35 = vadd.f32 %v770_v27, %v698_v30  ;;  %v665_v38 = vsel %vm629_vm10, %v1394_v20, 0.0  ;;  %v593_v39 = vadd.f32 %v561_v37, %v457_v34  ;;  %v769_v40 = vsel %vm733_vm11, %v1398_v22, 0.0 }
  0x1b   : > { %vm405_vm12 = vcmp.eq.s32.totalorder %v367_v9, %v1383_v14  ;;  %vm509_vm13 = vcmp.eq.s32.totalorder %v367_v9, %v1387_v16  ;;  %v786_v41 = vadd.f32 %v754_v33, %v682_v36  ;;  %vm613_vm14 = vcmp.eq.s32.totalorder %v367_v9, %v1392_v19 }
  0x1c   : > { %1232 = vmatprep.subr.mxu0 %v802_v35  ;;  %v441_v42 = vsel %vm405_vm12, %v1385_v15, 0.0  ;;  %v545_v43 = vsel %vm509_vm13, %v1389_v17, 0.0  ;;  %v697_v44 = vadd.f32 %v665_v38, %v593_v39  ;;  %v649_v46 = vsel %vm613_vm14, %v1394_v20, 0.0 }
  0x1d   : > { %v577_v45 = vadd.f32 %v545_v43, %v441_v42  ;;  %vm717_vm15 = vcmp.eq.s32.totalorder %v367_v9, %v1396_v21  ;;  %1233 = vmatpush3.msra.mxu0 %v786_v41  ;;  %vm420_vm0 = vcmp.eq.s32.totalorder %v1372_v12, %v1383_v14  ;;  %vm524_vm1 = vcmp.eq.s32.totalorder %v1372_v12, %v1387_v16 }
  0x1e   : > { %v753_v47 = vsel %vm717_vm15, %v1398_v22, 0.0  ;;  %vm628_vm2 = vcmp.eq.s32.totalorder %v1372_v12, %v1392_v19  ;;  %v801_v48 = vadd.f32 %v769_v40, %v697_v44  ;;  %v456_v50 = vsel %vm420_vm0, %v1385_v15, 0.0 }
  0x1f   : > { %v681_v49 = vadd.f32 %v649_v46, %v577_v45  ;;  %v560_v51 = vsel %vm524_vm1, %v1389_v17, 0.0  ;;  %v664_v53 = vsel %vm628_vm2, %v1394_v20, 0.0  ;;  %vm732_vm3 = vcmp.eq.s32.totalorder %v1372_v12, %v1396_v21 }
  0x20   : > { %v592_v52 = vadd.f32 %v560_v51, %v456_v50  ;;  %vm404_vm4 = vcmp.eq.s32.totalorder %v1375_v13, %v1383_v14  ;;  %1234 = vmatprep.subr.mxu0 %v801_v48  ;;  %v768_v55 = vsel %vm732_vm3, %v1398_v22, 0.0  ;;  %vm508_vm5 = vcmp.eq.s32.totalorder %v1375_v13, %v1387_v16 }
  0x21   : > { %v785_v54 = vadd.f32 %v753_v47, %v681_v49  ;;  %v440_v56 = vsel %vm404_vm4, %v1385_v15, 0.0  ;;  %v544_v58 = vsel %vm508_vm5, %v1389_v17, 0.0  ;;  %vm612_vm6 = vcmp.eq.s32.totalorder %v1375_v13, %v1392_v19 }
  0x22   : > { %v696_v57 = vadd.f32 %v664_v53, %v592_v52  ;;  %vm716_vm7 = vcmp.eq.s32.totalorder %v1375_v13, %v1396_v21  ;;  %v576_v59 = vadd.f32 %v544_v58, %v440_v56  ;;  %v648_v60 = vsel %vm612_vm6, %v1394_v20, 0.0 }
  0x23   : > { %1235 = vmatpush3.msra.mxu0 %v785_v54  ;;  %v752_v61 = vsel %vm716_vm7, %v1398_v22, 0.0  ;;  %v381_v62 = vadd.s32 224, %v1351_v1  ;;  %v365_v0 = vadd.s32 96, %v1351_v1  ;;  %v380_v2 = vadd.s32 216, %v1351_v1 }
  0x24   : > { %v800_v63 = vadd.f32 %v768_v55, %v696_v57  ;;  %v364_v3 = vadd.s32 88, %v1351_v1  ;;  %v680_v4 = vadd.f32 %v648_v60, %v576_v59  ;;  %v379_v38 = vadd.s32 208, %v1351_v1 }
  0x25   : > { %vm419_vm8 = vcmp.eq.s32.totalorder %v381_v62, %v1383_v14  ;;  %vm523_vm9 = vcmp.eq.s32.totalorder %v381_v62, %v1387_v16  ;;  %vm627_vm10 = vcmp.eq.s32.totalorder %v381_v62, %v1392_v19  ;;  %vm731_vm11 = vcmp.eq.s32.totalorder %v381_v62, %v1396_v21 }
  0x26   : > { %1236 = vmatprep.subr.mxu0 %v800_v63  ;;  %v455_v5 = vsel %vm419_vm8, %v1385_v15, 0.0  ;;  %v559_v6 = vsel %vm523_vm9, %v1389_v17, 0.0  ;;  %v663_v7 = vsel %vm627_vm10, %v1394_v20, 0.0  ;;  %v784_v8 = vadd.f32 %v752_v61, %v680_v4 }
  0x27   : > { %v591_v9 = vadd.f32 %v559_v6, %v455_v5  ;;  %v767_v10 = vsel %vm731_vm11, %v1398_v22, 0.0  ;;  %vm403_vm12 = vcmp.eq.s32.totalorder %v365_v0, %v1383_v14  ;;  %vm507_vm13 = vcmp.eq.s32.totalorder %v365_v0, %v1387_v16 }
  0x28   : > { %v439_v11 = vsel %vm403_vm12, %v1385_v15, 0.0  ;;  %vm611_vm14 = vcmp.eq.s32.totalorder %v365_v0, %v1392_v19  ;;  %vm715_vm15 = vcmp.eq.s32.totalorder %v365_v0, %v1396_v21  ;;  %1237 = vmatpush3.msra.mxu0 %v784_v8  ;;  %v543_v13 = vsel %vm507_vm13, %v1389_v17, 0.0 }
  0x29   : > { %v695_v12 = vadd.f32 %v663_v7, %v591_v9  ;;  %v647_v18 = vsel %vm611_vm14, %v1394_v20, 0.0  ;;  %v751_v23 = vsel %vm715_vm15, %v1398_v22, 0.0  ;;  %v575_v24 = vadd.f32 %v543_v13, %v439_v11 }
  0x2a   : > { %vm418_vm0 = vcmp.eq.s32.totalorder %v380_v2, %v1383_v14  ;;  %vm522_vm1 = vcmp.eq.s32.totalorder %v380_v2, %v1387_v16  ;;  %vm626_vm2 = vcmp.eq.s32.totalorder %v380_v2, %v1392_v19  ;;  %vm730_vm3 = vcmp.eq.s32.totalorder %v380_v2, %v1396_v21 }
  0x2b   : > { %v799_v25 = vadd.f32 %v767_v10, %v695_v12  ;;  %v454_v26 = vsel %vm418_vm0, %v1385_v15, 0.0  ;;  %v558_v27 = vsel %vm522_vm1, %v1389_v17, 0.0  ;;  %v662_v28 = vsel %vm626_vm2, %v1394_v20, 0.0 }
  0x2c   : > { %v679_v29 = vadd.f32 %v647_v18, %v575_v24  ;;  %v590_v30 = vadd.f32 %v558_v27, %v454_v26  ;;  %vm402_vm4 = vcmp.eq.s32.totalorder %v364_v3, %v1383_v14  ;;  %v766_v31 = vsel %vm730_vm3, %v1398_v22, 0.0 }
  0x2d   : > { %1238 = vmatprep.subr.mxu0 %v799_v25  ;;  %v438_v32 = vsel %vm402_vm4, %v1385_v15, 0.0  ;;  %vm506_vm5 = vcmp.eq.s32.totalorder %v364_v3, %v1387_v16  ;;  %vm610_vm6 = vcmp.eq.s32.totalorder %v364_v3, %v1392_v19  ;;  %vm714_vm7 = vcmp.eq.s32.totalorder %v364_v3, %v1396_v21 }
  0x2e   : > { %v783_v33 = vadd.f32 %v751_v23, %v679_v29  ;;  %v694_v34 = vadd.f32 %v662_v28, %v590_v30  ;;  %v542_v35 = vsel %vm506_vm5, %v1389_v17, 0.0  ;;  %v646_v36 = vsel %vm610_vm6, %v1394_v20, 0.0 }
  0x2f   : > { %v574_v37 = vadd.f32 %v542_v35, %v438_v32  ;;  %v363_v39 = vadd.s32 80, %v1351_v1  ;;  %v750_v41 = vsel %vm714_vm7, %v1398_v22, 0.0  ;;  %v378_v42 = vadd.s32 200, %v1351_v1 }
  0x30   : > { %1239 = vmatpush3.msra.mxu0 %v783_v33  ;;  %v798_v40 = vadd.f32 %v766_v31, %v694_v34  ;;  %v362_v43 = vadd.s32 72, %v1351_v1  ;;  %vm417_vm8 = vcmp.eq.s32.totalorder %v379_v38, %v1383_v14  ;;  %vm521_vm9 = vcmp.eq.s32.totalorder %v379_v38, %v1387_v16 }
  0x31   : > { %v678_v44 = vadd.f32 %v646_v36, %v574_v37  ;;  %vm625_vm10 = vcmp.eq.s32.totalorder %v379_v38, %v1392_v19  ;;  %v453_v45 = vsel %vm417_vm8, %v1385_v15, 0.0  ;;  %v557_v46 = vsel %vm521_vm9, %v1389_v17, 0.0 }
  0x32   : > { %1240 = vmatprep.subr.mxu0 %v798_v40  ;;  %v661_v47 = vsel %vm625_vm10, %v1394_v20, 0.0  ;;  %vm729_vm11 = vcmp.eq.s32.totalorder %v379_v38, %v1396_v21  ;;  %v589_v49 = vadd.f32 %v557_v46, %v453_v45  ;;  %vm401_vm12 = vcmp.eq.s32.totalorder %v363_v39, %v1383_v14 }
  0x33   : > { %v782_v48 = vadd.f32 %v750_v41, %v678_v44  ;;  %v765_v50 = vsel %vm729_vm11, %v1398_v22, 0.0  ;;  %v437_v51 = vsel %vm401_vm12, %v1385_v15, 0.0  ;;  %vm505_vm13 = vcmp.eq.s32.totalorder %v363_v39, %v1387_v16 }
  0x34   : > { %vm609_vm14 = vcmp.eq.s32.totalorder %v363_v39, %v1392_v19  ;;  %vm713_vm15 = vcmp.eq.s32.totalorder %v363_v39, %v1396_v21  ;;  %v693_v52 = vadd.f32 %v661_v47, %v589_v49  ;;  %v541_v53 = vsel %vm505_vm13, %v1389_v17, 0.0 }
  0x35   : > { %1241 = vmatpush3.msra.mxu0 %v782_v48  ;;  %v645_v54 = vsel %vm609_vm14, %v1394_v20, 0.0  ;;  %v749_v55 = vsel %vm713_vm15, %v1398_v22, 0.0  ;;  %v573_v56 = vadd.f32 %v541_v53, %v437_v51  ;;  %vm416_vm0 = vcmp.eq.s32.totalorder %v378_v42, %v1383_v14 }
  0x36   : > { %vm520_vm1 = vcmp.eq.s32.totalorder %v378_v42, %v1387_v16  ;;  %vm624_vm2 = vcmp.eq.s32.totalorder %v378_v42, %v1392_v19  ;;  %v797_v57 = vadd.f32 %v765_v50, %v693_v52  ;;  %v452_v58 = vsel %vm416_vm0, %v1385_v15, 0.0 }
  0x37   : > { %v556_v59 = vsel %vm520_vm1, %v1389_v17, 0.0  ;;  %v660_v60 = vsel %vm624_vm2, %v1394_v20, 0.0  ;;  %v677_v61 = vadd.f32 %v645_v54, %v573_v56  ;;  %vm728_vm3 = vcmp.eq.s32.totalorder %v378_v42, %v1396_v21 }
  0x38   : > { %v588_v62 = vadd.f32 %v556_v59, %v452_v58  ;;  %vm400_vm4 = vcmp.eq.s32.totalorder %v362_v43, %v1383_v14  ;;  %1242 = vmatprep.subr.mxu0 %v797_v57  ;;  %v764_v63 = vsel %vm728_vm3, %v1398_v22, 0.0  ;;  %vm504_vm5 = vcmp.eq.s32.totalorder %v362_v43, %v1387_v16 }
  0x39   : > { %v436_v0 = vsel %vm400_vm4, %v1385_v15, 0.0  ;;  %vm608_vm6 = vcmp.eq.s32.totalorder %v362_v43, %v1392_v19  ;;  %v781_v2 = vadd.f32 %v749_v55, %v677_v61  ;;  %v540_v4 = vsel %vm504_vm5, %v1389_v17, 0.0 }
  0x3a   : > { %v692_v3 = vadd.f32 %v660_v60, %v588_v62  ;;  %v644_v5 = vsel %vm608_vm6, %v1394_v20, 0.0  ;;  %v572_v6 = vadd.f32 %v540_v4, %v436_v0  ;;  %vm712_vm7 = vcmp.eq.s32.totalorder %v362_v43, %v1396_v21 }
  0x3b   : > { %v377_v7 = vadd.s32 192, %v1351_v1  ;;  %v361_v8 = vadd.s32 64, %v1351_v1  ;;  %1243 = vmatpush3.msra.mxu0 %v781_v2  ;;  %v748_v10 = vsel %vm712_vm7, %v1398_v22, 0.0  ;;  %v376_v11 = vadd.s32 184, %v1351_v1 }
  0x3c   : > { %v796_v9 = vadd.f32 %v764_v63, %v692_v3  ;;  %v360_v12 = vadd.s32 56, %v1351_v1  ;;  %v676_v13 = vadd.f32 %v644_v5, %v572_v6  ;;  %v375_v47 = vadd.s32 176, %v1351_v1 }
  0x3d   : > { %vm415_vm8 = vcmp.eq.s32.totalorder %v377_v7, %v1383_v14  ;;  %vm519_vm9 = vcmp.eq.s32.totalorder %v377_v7, %v1387_v16  ;;  %vm623_vm10 = vcmp.eq.s32.totalorder %v377_v7, %v1392_v19  ;;  %vm727_vm11 = vcmp.eq.s32.totalorder %v377_v7, %v1396_v21 }
  0x3e   : > { %1244 = vmatprep.subr.mxu0 %v796_v9  ;;  %v451_v18 = vsel %vm415_vm8, %v1385_v15, 0.0  ;;  %v555_v23 = vsel %vm519_vm9, %v1389_v17, 0.0  ;;  %v659_v24 = vsel %vm623_vm10, %v1394_v20, 0.0  ;;  %v780_v25 = vadd.f32 %v748_v10, %v676_v13 }
  0x3f   : > { %v587_v26 = vadd.f32 %v555_v23, %v451_v18  ;;  %v763_v27 = vsel %vm727_vm11, %v1398_v22, 0.0  ;;  %vm399_vm12 = vcmp.eq.s32.totalorder %v361_v8, %v1383_v14  ;;  %vm503_vm13 = vcmp.eq.s32.totalorder %v361_v8, %v1387_v16 }
  0x40   : > { %v435_v28 = vsel %vm399_vm12, %v1385_v15, 0.0  ;;  %vm607_vm14 = vcmp.eq.s32.totalorder %v361_v8, %v1392_v19  ;;  %vm711_vm15 = vcmp.eq.s32.totalorder %v361_v8, %v1396_v21  ;;  %1245 = vmatpush3.msra.mxu0 %v780_v25  ;;  %v539_v30 = vsel %vm503_vm13, %v1389_v17, 0.0 }
  0x41   : > { %v691_v29 = vadd.f32 %v659_v24, %v587_v26  ;;  %v643_v31 = vsel %vm607_vm14, %v1394_v20, 0.0  ;;  %v747_v32 = vsel %vm711_vm15, %v1398_v22, 0.0  ;;  %v571_v33 = vadd.f32 %v539_v30, %v435_v28 }
  0x42   : > { %vm414_vm0 = vcmp.eq.s32.totalorder %v376_v11, %v1383_v14  ;;  %vm518_vm1 = vcmp.eq.s32.totalorder %v376_v11, %v1387_v16  ;;  %vm622_vm2 = vcmp.eq.s32.totalorder %v376_v11, %v1392_v19  ;;  %vm726_vm3 = vcmp.eq.s32.totalorder %v376_v11, %v1396_v21 }
  0x43   : > { %v795_v34 = vadd.f32 %v763_v27, %v691_v29  ;;  %v450_v35 = vsel %vm414_vm0, %v1385_v15, 0.0  ;;  %v554_v36 = vsel %vm518_vm1, %v1389_v17, 0.0  ;;  %v658_v37 = vsel %vm622_vm2, %v1394_v20, 0.0 }
  0x44   : > { %v675_v38 = vadd.f32 %v643_v31, %v571_v33  ;;  %v586_v39 = vadd.f32 %v554_v36, %v450_v35  ;;  %vm398_vm4 = vcmp.eq.s32.totalorder %v360_v12, %v1383_v14  ;;  %v762_v40 = vsel %vm726_vm3, %v1398_v22, 0.0 }
  0x45   : > { %1246 = vmatprep.subr.mxu0 %v795_v34  ;;  %v434_v41 = vsel %vm398_vm4, %v1385_v15, 0.0  ;;  %vm502_vm5 = vcmp.eq.s32.totalorder %v360_v12, %v1387_v16  ;;  %vm606_vm6 = vcmp.eq.s32.totalorder %v360_v12, %v1392_v19  ;;  %vm710_vm7 = vcmp.eq.s32.totalorder %v360_v12, %v1396_v21 }
  0x46   : > { %v779_v42 = vadd.f32 %v747_v32, %v675_v38  ;;  %v690_v43 = vadd.f32 %v658_v37, %v586_v39  ;;  %v538_v44 = vsel %vm502_vm5, %v1389_v17, 0.0  ;;  %v642_v45 = vsel %vm606_vm6, %v1394_v20, 0.0 }
  0x47   : > { %v570_v46 = vadd.f32 %v538_v44, %v434_v41  ;;  %v359_v48 = vadd.s32 48, %v1351_v1  ;;  %v746_v50 = vsel %vm710_vm7, %v1398_v22, 0.0  ;;  %v374_v51 = vadd.s32 168, %v1351_v1 }
  0x48   : > { %1247 = vmatpush3.msra.mxu0 %v779_v42  ;;  %v794_v49 = vadd.f32 %v762_v40, %v690_v43  ;;  %v358_v52 = vadd.s32 40, %v1351_v1  ;;  %vm413_vm8 = vcmp.eq.s32.totalorder %v375_v47, %v1383_v14  ;;  %vm517_vm9 = vcmp.eq.s32.totalorder %v375_v47, %v1387_v16 }
  0x49   : > { %v674_v53 = vadd.f32 %v642_v45, %v570_v46  ;;  %vm621_vm10 = vcmp.eq.s32.totalorder %v375_v47, %v1392_v19  ;;  %v449_v54 = vsel %vm413_vm8, %v1385_v15, 0.0  ;;  %v553_v55 = vsel %vm517_vm9, %v1389_v17, 0.0 }
  0x4a   : > { %1248 = vmatprep.subr.mxu0 %v794_v49  ;;  %v657_v56 = vsel %vm621_vm10, %v1394_v20, 0.0  ;;  %vm725_vm11 = vcmp.eq.s32.totalorder %v375_v47, %v1396_v21  ;;  %v585_v58 = vadd.f32 %v553_v55, %v449_v54  ;;  %vm397_vm12 = vcmp.eq.s32.totalorder %v359_v48, %v1383_v14 }
  0x4b   : > { %v778_v57 = vadd.f32 %v746_v50, %v674_v53  ;;  %v761_v59 = vsel %vm725_vm11, %v1398_v22, 0.0  ;;  %v433_v60 = vsel %vm397_vm12, %v1385_v15, 0.0  ;;  %vm501_vm13 = vcmp.eq.s32.totalorder %v359_v48, %v1387_v16 }
  0x4c   : > { %vm605_vm14 = vcmp.eq.s32.totalorder %v359_v48, %v1392_v19  ;;  %vm709_vm15 = vcmp.eq.s32.totalorder %v359_v48, %v1396_v21  ;;  %v689_v61 = vadd.f32 %v657_v56, %v585_v58  ;;  %v537_v62 = vsel %vm501_vm13, %v1389_v17, 0.0 }
  0x4d   : > { %1249 = vmatpush3.msra.mxu0 %v778_v57  ;;  %v641_v63 = vsel %vm605_vm14, %v1394_v20, 0.0  ;;  %v745_v0 = vsel %vm709_vm15, %v1398_v22, 0.0  ;;  %v569_v2 = vadd.f32 %v537_v62, %v433_v60  ;;  %vm412_vm0 = vcmp.eq.s32.totalorder %v374_v51, %v1383_v14 }
  0x4e   : > { %vm516_vm1 = vcmp.eq.s32.totalorder %v374_v51, %v1387_v16  ;;  %vm620_vm2 = vcmp.eq.s32.totalorder %v374_v51, %v1392_v19  ;;  %v793_v3 = vadd.f32 %v761_v59, %v689_v61  ;;  %v448_v4 = vsel %vm412_vm0, %v1385_v15, 0.0 }
  0x4f   : > { %v552_v5 = vsel %vm516_vm1, %v1389_v17, 0.0  ;;  %v656_v6 = vsel %vm620_vm2, %v1394_v20, 0.0  ;;  %v673_v7 = vadd.f32 %v641_v63, %v569_v2  ;;  %vm724_vm3 = vcmp.eq.s32.totalorder %v374_v51, %v1396_v21 }
  0x50   : > { %v584_v8 = vadd.f32 %v552_v5, %v448_v4  ;;  %vm396_vm4 = vcmp.eq.s32.totalorder %v358_v52, %v1383_v14  ;;  %1250 = vmatprep.subr.mxu0 %v793_v3  ;;  %v760_v9 = vsel %vm724_vm3, %v1398_v22, 0.0  ;;  %vm500_vm5 = vcmp.eq.s32.totalorder %v358_v52, %v1387_v16 }
  0x51   : > { %v432_v10 = vsel %vm396_vm4, %v1385_v15, 0.0  ;;  %vm604_vm6 = vcmp.eq.s32.totalorder %v358_v52, %v1392_v19  ;;  %v777_v11 = vadd.f32 %v745_v0, %v673_v7  ;;  %v536_v13 = vsel %vm500_vm5, %v1389_v17, 0.0 }
  0x52   : > { %v688_v12 = vadd.f32 %v656_v6, %v584_v8  ;;  %v640_v18 = vsel %vm604_vm6, %v1394_v20, 0.0  ;;  %v568_v23 = vadd.f32 %v536_v13, %v432_v10  ;;  %vm708_vm7 = vcmp.eq.s32.totalorder %v358_v52, %v1396_v21 }
  0x53   : > { %v373_v24 = vadd.s32 160, %v1351_v1  ;;  %v357_v25 = vadd.s32 32, %v1351_v1  ;;  %1251 = vmatpush3.msra.mxu0 %v777_v11  ;;  %v744_v27 = vsel %vm708_vm7, %v1398_v22, 0.0  ;;  %v372_v28 = vadd.s32 152, %v1351_v1 }
  0x54   : > { %v792_v26 = vadd.f32 %v760_v9, %v688_v12  ;;  %v356_v29 = vadd.s32 24, %v1351_v1  ;;  %v672_v30 = vadd.f32 %v640_v18, %v568_v23  ;;  %v371_v56 = vadd.s32 144, %v1351_v1 }
  0x55   : > { %vm411_vm8 = vcmp.eq.s32.totalorder %v373_v24, %v1383_v14  ;;  %vm515_vm9 = vcmp.eq.s32.totalorder %v373_v24, %v1387_v16  ;;  %vm619_vm10 = vcmp.eq.s32.totalorder %v373_v24, %v1392_v19  ;;  %vm723_vm11 = vcmp.eq.s32.totalorder %v373_v24, %v1396_v21 }
  0x56   : > { %1252 = vmatprep.subr.mxu0 %v792_v26  ;;  %v447_v31 = vsel %vm411_vm8, %v1385_v15, 0.0  ;;  %v551_v32 = vsel %vm515_vm9, %v1389_v17, 0.0  ;;  %v655_v33 = vsel %vm619_vm10, %v1394_v20, 0.0  ;;  %v776_v34 = vadd.f32 %v744_v27, %v672_v30 }
  0x57   : > { %v583_v35 = vadd.f32 %v551_v32, %v447_v31  ;;  %v759_v36 = vsel %vm723_vm11, %v1398_v22, 0.0  ;;  %vm395_vm12 = vcmp.eq.s32.totalorder %v357_v25, %v1383_v14  ;;  %vm499_vm13 = vcmp.eq.s32.totalorder %v357_v25, %v1387_v16 }
  0x58   : > { %v431_v37 = vsel %vm395_vm12, %v1385_v15, 0.0  ;;  %vm603_vm14 = vcmp.eq.s32.totalorder %v357_v25, %v1392_v19  ;;  %vm707_vm15 = vcmp.eq.s32.totalorder %v357_v25, %v1396_v21  ;;  %1253 = vmatpush3.msra.mxu0 %v776_v34  ;;  %v535_v39 = vsel %vm499_vm13, %v1389_v17, 0.0 }
  0x59   : > { %v687_v38 = vadd.f32 %v655_v33, %v583_v35  ;;  %v639_v40 = vsel %vm603_vm14, %v1394_v20, 0.0  ;;  %v743_v41 = vsel %vm707_vm15, %v1398_v22, 0.0  ;;  %v567_v42 = vadd.f32 %v535_v39, %v431_v37 }
  0x5a   : > { %vm410_vm0 = vcmp.eq.s32.totalorder %v372_v28, %v1383_v14  ;;  %vm514_vm1 = vcmp.eq.s32.totalorder %v372_v28, %v1387_v16  ;;  %vm618_vm2 = vcmp.eq.s32.totalorder %v372_v28, %v1392_v19  ;;  %vm722_vm3 = vcmp.eq.s32.totalorder %v372_v28, %v1396_v21 }
  0x5b   : > { %v791_v43 = vadd.f32 %v759_v36, %v687_v38  ;;  %v446_v44 = vsel %vm410_vm0, %v1385_v15, 0.0  ;;  %v550_v45 = vsel %vm514_vm1, %v1389_v17, 0.0  ;;  %v654_v46 = vsel %vm618_vm2, %v1394_v20, 0.0 }
  0x5c   : > { %v671_v47 = vadd.f32 %v639_v40, %v567_v42  ;;  %v582_v48 = vadd.f32 %v550_v45, %v446_v44  ;;  %vm394_vm4 = vcmp.eq.s32.totalorder %v356_v29, %v1383_v14  ;;  %v758_v49 = vsel %vm722_vm3, %v1398_v22, 0.0 }
  0x5d   : > { %1254 = vmatprep.subr.mxu0 %v791_v43  ;;  %v430_v50 = vsel %vm394_vm4, %v1385_v15, 0.0  ;;  %vm498_vm5 = vcmp.eq.s32.totalorder %v356_v29, %v1387_v16  ;;  %vm602_vm6 = vcmp.eq.s32.totalorder %v356_v29, %v1392_v19  ;;  %vm706_vm7 = vcmp.eq.s32.totalorder %v356_v29, %v1396_v21 }
  0x5e   : > { %v775_v51 = vadd.f32 %v743_v41, %v671_v47  ;;  %v686_v52 = vadd.f32 %v654_v46, %v582_v48  ;;  %v534_v53 = vsel %vm498_vm5, %v1389_v17, 0.0  ;;  %v638_v54 = vsel %vm602_vm6, %v1394_v20, 0.0 }
  0x5f   : > { %v566_v55 = vadd.f32 %v534_v53, %v430_v50  ;;  %v355_v57 = vadd.s32 16, %v1351_v1  ;;  %v742_v59 = vsel %vm706_vm7, %v1398_v22, 0.0  ;;  %v370_v60 = vadd.s32 136, %v1351_v1  ;;  %v804_v53 = vld [vmem:[%s327_s22 + $0x8] sm:$0xff] }
  0x60   : > { %1255 = vmatpush3.msra.mxu0 %v775_v51  ;;  %v790_v58 = vadd.f32 %v758_v49, %v686_v52  ;;  %v354_v61 = vadd.s32 8, %v1351_v1  ;;  %vm409_vm8 = vcmp.eq.s32.totalorder %v371_v56, %v1383_v14  ;;  %vm513_vm9 = vcmp.eq.s32.totalorder %v371_v56, %v1387_v16  ;;  %v350_v49 = vld [vmem:[%s1720_s5] sm:$0xff] }
  0x61   : > { %v670_v62 = vadd.f32 %v638_v54, %v566_v55  ;;  %vm617_vm10 = vcmp.eq.s32.totalorder %v371_v56, %v1392_v19  ;;  %v445_v63 = vsel %vm409_vm8, %v1385_v15, 0.0  ;;  %v549_v0 = vsel %vm513_vm9, %v1389_v17, 0.0  ;;  %v351_v52 = vld [vmem:[%s1721_s6] sm:$0xff] }
  0x62   : > { %1256 = vmatprep.subr.mxu0 %v790_v58  ;;  %v653_v2 = vsel %vm617_vm10, %v1394_v20, 0.0  ;;  %vm721_vm11 = vcmp.eq.s32.totalorder %v371_v56, %v1396_v21  ;;  %v581_v4 = vadd.f32 %v549_v0, %v445_v63  ;;  %vm393_vm12 = vcmp.eq.s32.totalorder %v355_v57, %v1383_v14  ;;  %v803_v55 = vld [vmem:[%s327_s22] sm:$0xff] }
  0x63   : > { %v774_v3 = vadd.f32 %v742_v59, %v670_v62  ;;  %v757_v5 = vsel %vm721_vm11, %v1398_v22, 0.0  ;;  %v429_v6 = vsel %vm393_vm12, %v1385_v15, 0.0  ;;  %vm497_vm13 = vcmp.eq.s32.totalorder %v355_v57, %v1387_v16 }
  0x64   : > { %vm601_vm14 = vcmp.eq.s32.totalorder %v355_v57, %v1392_v19  ;;  %vm705_vm15 = vcmp.eq.s32.totalorder %v355_v57, %v1396_v21  ;;  %v685_v7 = vadd.f32 %v653_v2, %v581_v4  ;;  %v533_v8 = vsel %vm497_vm13, %v1389_v17, 0.0 }
  0x65   : > { %1257 = vmatpush3.msra.mxu0 %v774_v3  ;;  %v637_v9 = vsel %vm601_vm14, %v1394_v20, 0.0  ;;  %v741_v10 = vsel %vm705_vm15, %v1398_v22, 0.0  ;;  %v565_v11 = vadd.f32 %v533_v8, %v429_v6  ;;  %vm408_vm0 = vcmp.eq.s32.totalorder %v370_v60, %v1383_v14 }
  0x66   : > { %vm512_vm1 = vcmp.eq.s32.totalorder %v370_v60, %v1387_v16  ;;  %vm616_vm2 = vcmp.eq.s32.totalorder %v370_v60, %v1392_v19  ;;  %v789_v12 = vadd.f32 %v757_v5, %v685_v7  ;;  %v444_v13 = vsel %vm408_vm0, %v1385_v15, 0.0 }
  0x67   : > { %v548_v18 = vsel %vm512_vm1, %v1389_v17, 0.0  ;;  %v652_v23 = vsel %vm616_vm2, %v1394_v20, 0.0  ;;  %v669_v24 = vadd.f32 %v637_v9, %v565_v11  ;;  %vm720_vm3 = vcmp.eq.s32.totalorder %v370_v60, %v1396_v21 }
  0x68   : > { %v580_v25 = vadd.f32 %v548_v18, %v444_v13  ;;  %vm392_vm4 = vcmp.eq.s32.totalorder %v354_v61, %v1383_v14  ;;  %1258 = vmatprep.subr.mxu0 %v789_v12  ;;  %v756_v26 = vsel %vm720_vm3, %v1398_v22, 0.0  ;;  %vm496_vm5 = vcmp.eq.s32.totalorder %v354_v61, %v1387_v16 }
  0x69   : > { %v428_v27 = vsel %vm392_vm4, %v1385_v15, 0.0  ;;  %vm600_vm6 = vcmp.eq.s32.totalorder %v354_v61, %v1392_v19  ;;  %v773_v28 = vadd.f32 %v741_v10, %v669_v24  ;;  %v532_v30 = vsel %vm496_vm5, %v1389_v17, 0.0 }
  0x6a   : > { %v684_v29 = vadd.f32 %v652_v23, %v580_v25  ;;  %v636_v31 = vsel %vm600_vm6, %v1394_v20, 0.0  ;;  %v564_v32 = vadd.f32 %v532_v30, %v428_v27  ;;  %vm704_vm7 = vcmp.eq.s32.totalorder %v354_v61, %v1396_v21 }
  0x6b   : > { %v369_v33 = vadd.s32 128, %v1351_v1  ;;  %vm391_vm8 = vcmp.eq.s32.totalorder %v1351_v1, %v1383_v14  ;;  %1259 = vmatpush3.msra.mxu0 %v773_v28  ;;  %v740_v35 = vsel %vm704_vm7, %v1398_v22, 0.0  ;;  %vm495_vm9 = vcmp.eq.s32.totalorder %v1351_v1, %v1387_v16 }
  0x6c   : > { %v788_v34 = vadd.f32 %v756_v26, %v684_v29  ;;  %v427_v36 = vsel %vm391_vm8, %v1385_v15, 0.0  ;;  %v668_v37 = vadd.f32 %v636_v31, %v564_v32  ;;  %v531_v43 = vsel %vm495_vm9, %v1389_v17, 0.0 }
  0x6d   : > { %vm407_vm10 = vcmp.eq.s32.totalorder %v369_v33, %v1383_v14  ;;  %vm511_vm11 = vcmp.eq.s32.totalorder %v369_v33, %v1387_v16  ;;  %vm615_vm12 = vcmp.eq.s32.totalorder %v369_v33, %v1392_v19  ;;  %vm719_vm13 = vcmp.eq.s32.totalorder %v369_v33, %v1396_v21 }
  0x6e   : > { %1260 = vmatprep.subr.mxu0 %v788_v34  ;;  %v443_v38 = vsel %vm407_vm10, %v1385_v15, 0.0  ;;  %v547_v39 = vsel %vm511_vm11, %v1389_v17, 0.0  ;;  %v651_v40 = vsel %vm615_vm12, %v1394_v20, 0.0  ;;  %v772_v41 = vadd.f32 %v740_v35, %v668_v37  ;;  %v806_v17 = vld [vmem:[%s1381_s13] sm:$0xff] }
  0x6f   : > { %v579_v42 = vadd.f32 %v547_v39, %v443_v38  ;;  %v755_v14 = vsel %vm719_vm13, %v1398_v22, 0.0  ;;  %v563_v16 = vadd.f32 %v531_v43, %v427_v36  ;;  %vm599_vm14 = vcmp.eq.s32.totalorder %v1351_v1, %v1392_v19  ;;  %v805_v19 = vld [vmem:[%s331_s17] sm:$0xff] }
  0x70   : > { %vm703_vm15 = vcmp.eq.s32.totalorder %v1351_v1, %v1396_v21  ;;  %1261 = vmatpush3.msra.mxu0 %v772_v41  ;;  %v635_v44 = vsel %vm599_vm14, %v1394_v20, 0.0  ;;  %v1299_v1 = vmov 0.0   ;;  %vm878_vm0 = vcmask 523264  }
  0x71   : > { %v683_v15 = vadd.f32 %v651_v40, %v579_v42  ;;  %v739_v45 = vsel %vm703_vm15, %v1398_v22, 0.0  ;;  %v667_v46 = vadd.f32 %v635_v44, %v563_v16  ;;  %1271 = vmatprep.subr.mxu1 %v1299_v1  ;;  %vm1300_vm1 = vmmov 0  }
  0x72   : > { %1272 = vmatpush3.xpose.msk.msra.mxu1 %vm878_vm0, %v805_v19  ;;  %1273 = vmatprep.mubr.msk.f32.mxu1 %vm1300_vm1, %v1299_v1  ;;  %vm956_vm2 = vcmask 64512  }
  0x73   : > { %v787_v47 = vadd.f32 %v755_v14, %v683_v15  ;;  %v771_v48 = vadd.f32 %v739_v45, %v667_v46  ;;  %1276 = vmatprep.subr.mxu1 %v1299_v1 }
  0x75   : > { %1262 = vmatprep.subr.mxu0 %v787_v47 }
  0x76   : > { %1263 = vmatpush3.msra.mxu0 %v771_v48 }
  0x77   : > { %873 = vmatmul.mubr.f32.vlgmr.msra.gmra.mxu0 %v806_v17 }
 0x137   : > { %v1264_v20 = vpop.f32.mrf.mxu0 }
 0x139   : > { %v1265_v21 = vpop.f32.mrf.mxu0 }
 0x13a   : > { %v1266_v22 = vadd.f32 %v1265_v21, %v1264_v20 }
 0x13c   : > { %1274 = vmatmul.mubr.msk.f32.vlgmr.msra.gmra.mxu1 %vm878_vm0, %v1266_v22 }
 0x13d   : > { %1278 = vmatprep.mubr.msk.f32.mxu1 %vm1300_vm1, %v1299_v1 }
 0x1fc   : > { %v951_v50 = vpop.f32.mrf.mxu1 }
 0x1fd   : > { %v955_v51 = vmul.f32 %v951_v50, %v350_v49 }
 0x1fe   : > { %v1275_v54 = vpop.f32.mrf.mxu1 }
 0x1ff   : > { %1277 = vmatpush3.msra.mxu1 %v955_v51 }
 0x200   : > { %1279 = vmatmul.mubr.msk.f32.vlgmr.msra.gmra.mxu1 %vm956_vm2, %v351_v52  ;;  %1063 = vmatprep.subr.mxu1 %v804_v53 }
 0x201   : > { %1064 = vmatpush1.msra.mxu1 %v803_v55  ;;  %1097 = vmatprep.mubr.f32.mxu1 %v1299_v1 }
 0x2c0   : > { %v1026_v56 = vpop.f32.mrf.mxu1 }
 0x2c1   : > { %1226 = vmatmul.mubr.msk.f32.vlgmr.msra.gmra.mxu1 %vm956_vm2, %v1026_v56 }
 0x2c2   : > { %v1280_v57 = vpop.f32.mrf.mxu1 }
 0x381   : > { %v1099_v58 = vpop.f32.mrf.mxu1 }
 0x382   : > { %1104 = vst [vmem:[%s349_s29] sm:$0xff] %v1099_v58 }
 0x383   : > { %v1101_v59 = vpop.f32.mrf.mxu1 }
 0x384   : > { %1105 = vst [vmem:[%s349_s29 + $0x8] sm:$0xff] %v1101_v59 }
 0x385 PF: > { %s17_s24 = sadd.s32 1, %s1297_s24  }
 0x386   : > { %p14_p4 = scmp.ge.s32.totalorder %s17_s24, 4  }
 0x388   :  { %16 = sbr.rel (!%p14_p4) target bundleno = 1 (0x1), region = 90 }

</bundles_post_ra>
